<compile_context>
chip_gen: v6e
topology: v6e:2x2x1
jax: 0.10.0
libtpu: 0.0.40
codegen_flags: <defaults>
</compile_context>

<pallas_src>
import functools

import jax
import jax.numpy as jnp
import numpy as np
from jax.experimental import pallas as pl
from jax.experimental.pallas import tpu as pltpu

_LANE = 128
_SUBLANE = 8


def _uout_kernel(seed_ref, x_ref, o_ref, *, beta):
    br, lanes_n = x_ref.shape

    # Global element index of every entry of this block (counter for the hash).
    base_row = pl.program_id(0).astype(jnp.uint32) * jnp.uint32(br)
    row_ids = jax.lax.broadcasted_iota(jnp.uint32, x_ref.shape, 0)
    lane_ids = jax.lax.broadcasted_iota(jnp.uint32, x_ref.shape, 1)
    idx = (base_row + row_ids) * jnp.uint32(lanes_n) + lane_ids

    # Counter-based hash (lowbias32 finalizer) -> well-mixed 32 random bits
    # per element.  Pure uint32 VPU ops; deterministic in (seed, element idx).
    seed = seed_ref[0].astype(jnp.uint32)
    h = idx ^ (seed * jnp.uint32(0x9E3779B9))
    h = (h ^ (h >> jnp.uint32(16))) * jnp.uint32(0x21F0AAAD)
    h = (h ^ (h >> jnp.uint32(15))) * jnp.uint32(0x735A2D97)
    h = h ^ (h >> jnp.uint32(15))

    # 23 random mantissa bits with exponent of 2.0 -> float32 in [2, 4);
    # subtract 3.0 -> uniform in [-1, 1); one multiply by beta -> [-beta, beta).
    fbits = (h >> jnp.uint32(9)) | jnp.uint32(0x40000000)
    u = jax.lax.bitcast_convert_type(fbits, jnp.float32) - 3.0
    noise = (beta * u).astype(o_ref.dtype)

    o_ref[...] = x_ref[...] + noise


def uout(x, seed, *, beta, training=True, block_rows=4096):
    """Uout forward: x + U[-beta, beta) noise in training mode, identity otherwise.

    Args:
      x:     any-shaped float array.
      seed:  int32 scalar (array or Python int); noise is a deterministic
             function of (seed, element index).
      beta:  noise half-width (> 0).
      training: static Python bool; eval mode returns `x` unchanged.
      block_rows: rows of the (rows, 128) slab processed per grid step.
    """
    if not training:
        return x

    orig_shape = x.shape
    dtype = x.dtype
    n = int(np.prod(orig_shape))
    if n == 0:
        return x

    # Lane-dense 2-D layout: (rows, 128).  Fast path (no pad / no final slice)
    # whenever n is a multiple of 8*128 — the common case for NN activations.
    if n % (_SUBLANE * _LANE) == 0:
        rows = n // _LANE
        x2d = x.reshape(rows, _LANE)
        padded = False
    else:
        rows = pl.cdiv(n, _LANE)
        rows = ((rows + _SUBLANE - 1) // _SUBLANE) * _SUBLANE
        x2d = jnp.pad(x.reshape(-1), (0, rows * _LANE - n)).reshape(rows, _LANE)
        padded = True

    br = min(block_rows, rows)
    if br != rows:
        br = max(_SUBLANE, (br // _SUBLANE) * _SUBLANE)  # keep (8,128)-aligned
    grid = (pl.cdiv(rows, br),)

    seed_arr = jnp.asarray(seed, jnp.int32).reshape((1,))
    itemsize = jnp.dtype(dtype).itemsize

    out2d = pl.pallas_call(
        functools.partial(_uout_kernel, beta=float(beta)),
        out_shape=jax.ShapeDtypeStruct((rows, _LANE), dtype),
        grid_spec=pltpu.PrefetchScalarGridSpec(
            num_scalar_prefetch=1,
            grid=grid,
            in_specs=[pl.BlockSpec((br, _LANE), lambda i, seed: (i, 0))],
            out_specs=pl.BlockSpec((br, _LANE), lambda i, seed: (i, 0)),
        ),
        compiler_params=pltpu.CompilerParams(
            dimension_semantics=("parallel",),      # blocks are independent
            vmem_limit_bytes=32 * 1024 * 1024,
        ),
        cost_estimate=pl.CostEstimate(
            flops=12 * n, transcendentals=0, bytes_accessed=2 * n * itemsize
        ),
    )(seed_arr, x2d)

    if padded:
        return out2d.reshape(-1)[:n].reshape(orig_shape)
    return out2d.reshape(orig_shape)


if __name__ == "__main__":
    beta = 0.1
    key = jax.random.PRNGKey(0)
    x = jax.random.normal(key, (2, 4, 16, 16), jnp.float32)

    run = jax.jit(functools.partial(uout, beta=beta, training=True))
    y = run(x, jnp.int32(42))
    jax.block_until_ready(y)

    # Sanity checks: noise is bounded by beta, nonzero, roughly centered.
    diff = np.asarray(y) - np.asarray(x)
    assert diff.shape == x.shape
    assert np.all(np.abs(diff) <= beta + 1e-6), "noise exceeds beta bound"
    assert np.max(np.abs(diff)) > 0.0, "no noise was added in training mode"
    assert abs(float(diff.mean())) < beta, "noise mean far from zero"

    # Ragged (padded) path.
    x_r = jax.random.normal(jax.random.PRNGKey(1), (3, 5, 7), jnp.float32)
    y_r = jax.block_until_ready(uout(x_r, jnp.int32(7), beta=beta, training=True))
    d_r = np.asarray(y_r) - np.asarray(x_r)
    assert d_r.shape == x_r.shape
    assert np.all(np.abs(d_r) <= beta + 1e-6)
    assert np.max(np.abs(d_r)) > 0.0

    # Eval mode is the identity.
    y_eval = uout(x, jnp.int32(42), beta=beta, training=False)
    np.testing.assert_array_equal(np.asarray(y_eval), np.asarray(x))

    print("KERNEL_OK")
</pallas_src>

<mosaic_0001>
module attributes {stable_mosaic.version = 11 : i64} {
  func.func @_uout_kernel(%arg0: i32, %arg1: memref<1xi32, #tpu.memory_space<smem>>, %arg2: memref<16x128xf32, #tpu.memory_space<vmem>>, %arg3: memref<16x128xf32, #tpu.memory_space<vmem>>) attributes {dimension_semantics = [#tpu.dimension_semantics<parallel>], iteration_bounds = array<i64: 1>, scalar_prefetch = 1 : i64, scratch_operands = 0 : i64, tpu.core_type = #tpu.core_type<tc>, window_params = [{transform_indices = @transform_0, window_bounds = array<i64: 16, 128>}, {transform_indices = @transform_1, window_bounds = array<i64: 16, 128>}]} {
    %c16_i32 = arith.constant 16 : i32
    %0 = arith.muli %arg0, %c16_i32 : i32
    %1 = tpu.iota {dimensions = array<i32: 0>} : vector<16x128xi32>
    %2 = tpu.iota {dimensions = array<i32: 1>} : vector<16x128xi32>
    %3 = vector.broadcast %0 : i32 to vector<16x128xi32>
    %4 = arith.addi %3, %1 : vector<16x128xi32>
    %c128_i32 = arith.constant 128 : i32
    %5 = vector.broadcast %c128_i32 : i32 to vector<16x128xi32>
    %6 = arith.muli %4, %5 : vector<16x128xi32>
    %7 = arith.addi %6, %2 : vector<16x128xi32>
    %c0 = arith.constant 0 : index
    %8 = memref.load %arg1[%c0] : memref<1xi32, #tpu.memory_space<smem>>
    %c-1640531527_i32 = arith.constant -1640531527 : i32
    %9 = arith.muli %8, %c-1640531527_i32 : i32
    %10 = vector.broadcast %9 : i32 to vector<16x128xi32>
    %11 = arith.xori %7, %10 : vector<16x128xi32>
    %c16_i32_0 = arith.constant 16 : i32
    %12 = vector.broadcast %c16_i32_0 : i32 to vector<16x128xi32>
    %13 = arith.shrui %11, %12 : vector<16x128xi32>
    %14 = arith.xori %11, %13 : vector<16x128xi32>
    %c569420461_i32 = arith.constant 569420461 : i32
    %15 = vector.broadcast %c569420461_i32 : i32 to vector<16x128xi32>
    %16 = arith.muli %14, %15 : vector<16x128xi32>
    %c15_i32 = arith.constant 15 : i32
    %17 = vector.broadcast %c15_i32 : i32 to vector<16x128xi32>
    %18 = arith.shrui %16, %17 : vector<16x128xi32>
    %19 = arith.xori %16, %18 : vector<16x128xi32>
    %c1935289751_i32 = arith.constant 1935289751 : i32
    %20 = vector.broadcast %c1935289751_i32 : i32 to vector<16x128xi32>
    %21 = arith.muli %19, %20 : vector<16x128xi32>
    %c15_i32_1 = arith.constant 15 : i32
    %22 = vector.broadcast %c15_i32_1 : i32 to vector<16x128xi32>
    %23 = arith.shrui %21, %22 : vector<16x128xi32>
    %24 = arith.xori %21, %23 : vector<16x128xi32>
    %c9_i32 = arith.constant 9 : i32
    %25 = vector.broadcast %c9_i32 : i32 to vector<16x128xi32>
    %26 = arith.shrui %24, %25 : vector<16x128xi32>
    %c1073741824_i32 = arith.constant 1073741824 : i32
    %27 = vector.broadcast %c1073741824_i32 : i32 to vector<16x128xi32>
    %28 = arith.ori %26, %27 : vector<16x128xi32>
    %29 = tpu.bitcast %28 : vector<16x128xi32> -> vector<16x128xf32>
    %cst = arith.constant 3.000000e+00 : f32
    %30 = vector.broadcast %cst : f32 to vector<16x128xf32>
    %31 = arith.subf %29, %30 : vector<16x128xf32>
    %cst_2 = arith.constant 1.000000e-01 : f32
    %32 = vector.broadcast %cst_2 : f32 to vector<16x128xf32>
    %33 = arith.mulf %32, %31 : vector<16x128xf32>
    %c0_3 = arith.constant 0 : index
    %c0_4 = arith.constant 0 : index
    %34 = vector.load %arg2[%c0_3, %c0_4] : memref<16x128xf32, #tpu.memory_space<vmem>>, vector<16x128xf32>
    %35 = arith.addf %34, %33 : vector<16x128xf32>
    %c0_5 = arith.constant 0 : index
    %c0_6 = arith.constant 0 : index
    %36 = vector.load %arg3[%c0_5, %c0_6] : memref<16x128xf32, #tpu.memory_space<vmem>>, vector<16x128xf32>
    tpu.vector_store %arg3[%c0_5, %c0_6], %35 {strides = array<i32>} : memref<16x128xf32, #tpu.memory_space<vmem>>, vector<16x128xf32>,
    return
  }
  func.func @transform_0(%arg0: i32, %arg1: memref<1xi32, #tpu.memory_space<smem>>) -> (i32, i32) {
    %c0_i32 = arith.constant 0 : i32
    %c0_i32_0 = arith.constant 0 : i32
    return %arg0, %c0_i32 : i32, i32
  }
  func.func @transform_1(%arg0: i32, %arg1: memref<1xi32, #tpu.memory_space<smem>>) -> (i32, i32) {
    %c0_i32 = arith.constant 0 : i32
    %c0_i32_0 = arith.constant 0 : i32
    return %arg0, %c0_i32 : i32, i32
  }
}

</mosaic_0001>

<bundles_post_ra>
// kernel: uout.1
= control target key start
LH: loop header
LB: loop body
LE: loop exit
PB: predicated region body
PF: predicated region fallthrough
CT: control target
= control target key end

     0   :  { %v11_v0 = vlaneseq  ;;  %s96_s0 = inlined_call_operand.<no memory space> [shape: s32[1], index: 0, kind: input, shape index: {}]   ;;  %s97_s1 = inlined_call_operand.vmem [shape: f32[16,128], index: 1, kind: input, shape index: {}]   ;;  %s98_s2 = inlined_call_operand.vmem [shape: f32[16,128], index: 2, kind: output, shape index: {}]  }
   0x1   :  { %s24_s11 = smul.u32 2654435769, %s96_s0  ;;  %v54_v32 = vld [vmem:[%s97_s1] sm:$0xff]  ;;  %v55_v35 = vld [vmem:[%s97_s1 + $0x8] sm:$0xff] }
   0x2   :  { %v12_v1 = vshrl.u32 %v11_v0, 7  ;;  %v15_v2 = vand.u32 127, %v11_v0 }
   0x3   :  { %v25_v5 = vstv %s24_s11 }
   0x4   :  { %v19_v3 = vmul.u32 128, %v12_v1  ;;  %v13_v4 = vadd.s32 8, %v12_v1 }
   0x6   :  { %v21_v6 = vadd.s32 %v19_v3, %v15_v2  ;;  %v20_v7 = vmul.u32 128, %v13_v4 }
   0x8   :  { %v26_v8 = vxor.u32 %v25_v5, %v21_v6  ;;  %v22_v9 = vadd.s32 %v20_v7, %v15_v2 }
   0xa   :  { %v28_v10 = vshrl.u32 %v26_v8, 16  ;;  %v27_v11 = vxor.u32 %v25_v5, %v22_v9 }
   0xc   :  { %v30_v12 = vxor.u32 %v28_v10, %v26_v8  ;;  %v29_v13 = vshrl.u32 %v27_v11, 16 }
   0xe   :  { %v32_v14 = vmul.u32 569420461, %v30_v12  ;;  %v31_v15 = vxor.u32 %v29_v13, %v27_v11 }
  0x10   :  { %v34_v16 = vshrl.u32 %v32_v14, 15  ;;  %v33_v17 = vmul.u32 569420461, %v31_v15 }
  0x12   :  { %v36_v18 = vxor.u32 %v34_v16, %v32_v14  ;;  %v35_v19 = vshrl.u32 %v33_v17, 15 }
  0x14   :  { %v38_v20 = vmul.u32 1935289751, %v36_v18  ;;  %v37_v21 = vxor.u32 %v35_v19, %v33_v17 }
  0x16   :  { %v40_v22 = vshrl.u32 %v38_v20, 15  ;;  %v39_v23 = vmul.u32 1935289751, %v37_v21 }
  0x18   :  { %v42_v24 = vxor.u32 %v40_v22, %v38_v20  ;;  %v41_v25 = vshrl.u32 %v39_v23, 15 }
  0x1a   :  { %v44_v26 = vshrl.u32 %v42_v24, 9  ;;  %v43_v27 = vxor.u32 %v41_v25, %v39_v23 }
  0x1c   :  { %v46_v28 = vor.u32 1073741824, %v44_v26  ;;  %v45_v29 = vshrl.u32 %v43_v27, 9 }
  0x1e   :  { %v64_v30 = vadd.f32 -3.0, %v46_v28  ;;  %v47_v31 = vor.u32 1073741824, %v45_v29 }
  0x20   :  { %v52_v33 = vmul.f32 0.1, %v64_v30  ;;  %v65_v34 = vadd.f32 -3.0, %v47_v31 }
  0x22   :  { %v56_v36 = vadd.f32 %v54_v32, %v52_v33  ;;  %v53_v37 = vmul.f32 0.1, %v65_v34 }
  0x24   :  { %58 = vst [vmem:[%s98_s2] sm:$0xff] %v56_v36  ;;  %v57_v38 = vadd.f32 %v55_v35, %v53_v37 }
  0x26   :  { %59 = vst [vmem:[%s98_s2 + $0x8] sm:$0xff] %v57_v38 }

</bundles_post_ra>
